<compile_context>
chip_gen: v7x
topology: tpu7x:2x2x1
jax: 0.10.0
libtpu: 0.0.40
codegen_flags: <defaults>
</compile_context>

<pallas_src>
import jax
import jax.numpy as jnp
from jax.experimental import pallas as pl
from jax.experimental.pallas import tpu as pltpu

HIDDEN = 256  # discriminator_dim = (256, 256)


def _disc_kernel(x_ref, w1_ref, b1_ref, w2_ref, b2_ref, w3_ref, b3_ref, o_ref):
    # Layer 1: Linear(pacdim, 256) + LeakyReLU(0.2).  bf16 MXU operands, f32 acc.
    h = jnp.dot(x_ref[...], w1_ref[...], preferred_element_type=jnp.float32)
    h = h + b1_ref[...]
    h = jnp.where(h >= 0.0, h, 0.2 * h)
    # Dropout(0.5) -> identity at inference.
    # TODO(synk): training-mode dropout RNG not implemented.

    # Layer 2: Linear(256, 256) + LeakyReLU(0.2).
    h = jnp.dot(h.astype(jnp.bfloat16), w2_ref[...],
                preferred_element_type=jnp.float32)
    h = h + b2_ref[...]
    h = jnp.where(h >= 0.0, h, 0.2 * h)
    # Dropout(0.5) -> identity at inference.

    # Layer 3: Linear(256, 1) kept off the MXU: VPU multiply by the broadcast
    # w3 row + XLU lane reduction -> one f32 scalar per row, stored as (TM, 1).
    out = jnp.sum(h * w3_ref[...], axis=-1, keepdims=True)
    o_ref[...] = out + b3_ref[...]


def _vmem_capacity_bytes():
    """Generation-aware VMEM capacity; conservative fallback is v7x's 64 MiB."""
    try:
        return int(pltpu.get_tpu_info().vmem_capacity_bytes)
    except Exception:
        return 64 * 1024 * 1024


def _pick_tm(m, pacdim):
    """Largest multiple-of-128 row tile (capped at 2048) whose full per-step
    footprint — double-buffered bf16 x tile, double-buffered f32 output
    column, resident weights and in-kernel f32 activations — stays within
    ~60% of this chip's VMEM."""
    budget = int(_vmem_capacity_bytes() * 0.6)
    # Resident weights/biases (Pallas double-buffers even constant-index blocks).
    fixed = 2 * (pacdim * HIDDEN * 2      # W1 (bf16)
                 + HIDDEN * HIDDEN * 2    # W2 (bf16)
                 + 3 * HIDDEN * 4         # b1, b2, w3 row (f32)
                 + 4)                     # b3
    fixed += 1 << 20                      # slack: semaphores / misc scratch
    # Per packed row: double-buffered bf16 x tile + double-buffered f32 output
    # column + ~4 KiB of f32/bf16 activation temporaries inside the kernel.
    per_row = 2 * 2 * pacdim + 2 * 4 + 4096
    tm = (budget - fixed) // per_row
    tm = max(128, min(2048, (tm // 128) * 128))
    if m <= tm:
        return m, 1
    return tm, pl.cdiv(m, tm)


def discriminator_forward(x, prepared_params, pac):
    """x: (B, input_dim) float32.  Returns (B // pac, 1) float32."""
    w1, b1, w2, b2, w3, b3 = prepared_params
    B, input_dim = x.shape
    pacdim = input_dim * pac
    M = B // pac

    # Pack `pac` rows together and cast to bf16 once (fused reshape+convert);
    # halves the kernel's input DMA bytes.  No K padding copy: W1 keeps its
    # true shape and Mosaic pads tiles internally.
    x_rows = x.reshape(M, pacdim).astype(jnp.bfloat16)

    tm, grid_m = _pick_tm(M, pacdim)
    vmem_limit = min(int(_vmem_capacity_bytes() * 0.7), 100 * 1024 * 1024)

    resident = lambda shape: pl.BlockSpec(shape, lambda i: (0, 0))

    out = pl.pallas_call(
        _disc_kernel,
        out_shape=jax.ShapeDtypeStruct((M, 1), jnp.float32),
        grid=(grid_m,),
        in_specs=[
            pl.BlockSpec((tm, pacdim), lambda i: (i, 0)),  # x row tiles (pipelined)
            resident((pacdim, HIDDEN)),                    # W1 (bf16, resident)
            resident((1, HIDDEN)),                         # b1 (f32)
            resident((HIDDEN, HIDDEN)),                    # W2 (bf16)
            resident((1, HIDDEN)),                         # b2 (f32)
            resident((1, HIDDEN)),                         # w3 row (f32)
            resident((1, 1)),                              # b3 (f32)
        ],
        out_specs=pl.BlockSpec((tm, 1), lambda i: (i, 0)),  # slim per-row scalars
        compiler_params=pltpu.CompilerParams(
            dimension_semantics=("parallel",),             # megacore-shardable
            vmem_limit_bytes=vmem_limit,
        ),
    )(x_rows, w1, b1, w2, b2, w3, b3)

    return out


def init_params(key, input_dim, pac):
    """Torch-default Linear init U(-1/sqrt(fan_in), +1/sqrt(fan_in)).

    Weights are stored transposed vs. torch ((in, out) instead of (out, in))."""
    pacdim = input_dim * pac
    dims = [(pacdim, HIDDEN), (HIDDEN, HIDDEN), (HIDDEN, 1)]
    params = []
    for i, (fan_in, fan_out) in enumerate(dims):
        kw, kb = jax.random.split(jax.random.fold_in(key, i))
        bound = 1.0 / (fan_in ** 0.5)
        w = jax.random.uniform(kw, (fan_in, fan_out), jnp.float32, -bound, bound)
        b = jax.random.uniform(kb, (1, fan_out), jnp.float32, -bound, bound)
        params += [w, b]
    return tuple(params)


def prepare_params(params):
    """One-time layout prep for the kernel: bf16 MXU weights (true shapes, no
    padding), the final (256, 1) column stored as an f32 (1, 256) row for the
    VPU/XLU layer-3 path.  Biases stay f32."""
    w1, b1, w2, b2, w3, b3 = params
    return (
        w1.astype(jnp.bfloat16),
        b1,
        w2.astype(jnp.bfloat16),
        b2,
        w3.reshape(1, HIDDEN).astype(jnp.float32),
        b3.reshape(1, 1).astype(jnp.float32),
    )


def reference_forward(x, params, pac):
    """Pure-JAX reference mirroring the kernel's numerics: bf16 operands with
    f32 accumulation for layers 1-2, full f32 for layer 3 (eval-mode PyTorch
    semantics up to bf16 rounding of inputs/weights)."""
    w1, b1, w2, b2, w3, b3 = params
    B, input_dim = x.shape
    bf = jnp.bfloat16
    h = x.reshape(B // pac, input_dim * pac).astype(bf)
    h = jnp.dot(h, w1.astype(bf), preferred_element_type=jnp.float32) + b1
    h = jnp.where(h >= 0.0, h, 0.2 * h)
    h = jnp.dot(h.astype(bf), w2.astype(bf), preferred_element_type=jnp.float32) + b2
    h = jnp.where(h >= 0.0, h, 0.2 * h)
    return jnp.dot(h, w3, preferred_element_type=jnp.float32) + b3


if __name__ == "__main__":
    input_dim = 16
    pac = 8
    batch = 16  # must be divisible by pac -> 2 packed rows

    key = jax.random.PRNGKey(0)
    k_x, k_p = jax.random.split(key)
    x = jax.random.normal(k_x, (batch, input_dim), dtype=jnp.float32)
    params = init_params(k_p, input_dim, pac)
    prepared = prepare_params(params)

    out = discriminator_forward(x, prepared, pac)
    out = jax.block_until_ready(out)

    ref = reference_forward(x, params, pac)
    assert out.shape == (batch // pac, 1), out.shape
    assert jnp.allclose(out, ref, atol=2e-3, rtol=2e-3), (out, ref)

    print("KERNEL_OK")
</pallas_src>

<mosaic_0001>
module attributes {stable_mosaic.version = 11 : i64} {
  func.func @_disc_kernel(%arg0: i32, %arg1: memref<2x128xbf16, #tpu.memory_space<vmem>>, %arg2: memref<128x256xbf16, #tpu.memory_space<vmem>>, %arg3: memref<1x256xf32, #tpu.memory_space<vmem>>, %arg4: memref<256x256xbf16, #tpu.memory_space<vmem>>, %arg5: memref<1x256xf32, #tpu.memory_space<vmem>>, %arg6: memref<1x256xf32, #tpu.memory_space<vmem>>, %arg7: memref<1x1xf32, #tpu.memory_space<vmem>>, %arg8: memref<2x1xf32, #tpu.memory_space<vmem>>) attributes {dimension_semantics = [#tpu.dimension_semantics<parallel>], iteration_bounds = array<i64: 1>, scalar_prefetch = 0 : i64, scratch_operands = 0 : i64, tpu.core_type = #tpu.core_type<tc>, window_params = [{transform_indices = @transform_0, window_bounds = array<i64: 2, 128>}, {pipeline_mode = #tpu.pipeline_mode<synchronous>, transform_indices = @transform_1, window_bounds = array<i64: 128, 256>}, {pipeline_mode = #tpu.pipeline_mode<synchronous>, transform_indices = @transform_2, window_bounds = array<i64: 1, 256>}, {pipeline_mode = #tpu.pipeline_mode<synchronous>, transform_indices = @transform_3, window_bounds = array<i64: 256, 256>}, {pipeline_mode = #tpu.pipeline_mode<synchronous>, transform_indices = @transform_4, window_bounds = array<i64: 1, 256>}, {pipeline_mode = #tpu.pipeline_mode<synchronous>, transform_indices = @transform_5, window_bounds = array<i64: 1, 256>}, {pipeline_mode = #tpu.pipeline_mode<synchronous>, transform_indices = @transform_6, window_bounds = array<i64: 1, 1>}, {transform_indices = @transform_7, window_bounds = array<i64: 2, 1>}]} {
    %c0 = arith.constant 0 : index
    %c0_0 = arith.constant 0 : index
    %0 = vector.load %arg1[%c0, %c0_0] : memref<2x128xbf16, #tpu.memory_space<vmem>>, vector<2x128xbf16>
    %c0_1 = arith.constant 0 : index
    %c0_2 = arith.constant 0 : index
    %1 = vector.load %arg2[%c0_1, %c0_2] : memref<128x256xbf16, #tpu.memory_space<vmem>>, vector<128x256xbf16>
    %cst = arith.constant dense<0.000000e+00> : vector<2x256xf32>
    %2 = tpu.matmul %0, %1, %cst {dimension_numbers = #tpu.dot_dimension_numbers<[1], [0], [0], [1], [0, 0, 1, 1], [], []>} : vector<2x128xbf16>, vector<128x256xbf16>, vector<2x256xf32> -> vector<2x256xf32>
    %c0_3 = arith.constant 0 : index
    %c0_4 = arith.constant 0 : index
    %3 = vector.load %arg3[%c0_3, %c0_4] : memref<1x256xf32, #tpu.memory_space<vmem>>, vector<1x256xf32>
    %4 = vector.broadcast %3 : vector<1x256xf32> to vector<2x256xf32>
    %5 = arith.addf %2, %4 : vector<2x256xf32>
    %cst_5 = arith.constant 0.000000e+00 : f32
    %6 = vector.broadcast %cst_5 : f32 to vector<2x256xf32>
    %7 = arith.cmpf oge, %5, %6 : vector<2x256xf32>
    %cst_6 = arith.constant 2.000000e-01 : f32
    %8 = vector.broadcast %cst_6 : f32 to vector<2x256xf32>
    %9 = arith.mulf %8, %5 : vector<2x256xf32>
    %10 = arith.select %7, %5, %9 : vector<2x256xi1>, vector<2x256xf32>
    %11 = arith.truncf %10 : vector<2x256xf32> to vector<2x256xbf16>
    %c0_7 = arith.constant 0 : index
    %c0_8 = arith.constant 0 : index
    %12 = vector.load %arg4[%c0_7, %c0_8] : memref<256x256xbf16, #tpu.memory_space<vmem>>, vector<256x256xbf16>
    %cst_9 = arith.constant dense<0.000000e+00> : vector<2x256xf32>
    %13 = tpu.matmul %11, %12, %cst_9 {dimension_numbers = #tpu.dot_dimension_numbers<[1], [0], [0], [1], [0, 0, 1, 1], [], []>} : vector<2x256xbf16>, vector<256x256xbf16>, vector<2x256xf32> -> vector<2x256xf32>
    %c0_10 = arith.constant 0 : index
    %c0_11 = arith.constant 0 : index
    %14 = vector.load %arg5[%c0_10, %c0_11] : memref<1x256xf32, #tpu.memory_space<vmem>>, vector<1x256xf32>
    %15 = vector.broadcast %14 : vector<1x256xf32> to vector<2x256xf32>
    %16 = arith.addf %13, %15 : vector<2x256xf32>
    %cst_12 = arith.constant 0.000000e+00 : f32
    %17 = vector.broadcast %cst_12 : f32 to vector<2x256xf32>
    %18 = arith.cmpf oge, %16, %17 : vector<2x256xf32>
    %cst_13 = arith.constant 2.000000e-01 : f32
    %19 = vector.broadcast %cst_13 : f32 to vector<2x256xf32>
    %20 = arith.mulf %19, %16 : vector<2x256xf32>
    %21 = arith.select %18, %16, %20 : vector<2x256xi1>, vector<2x256xf32>
    %c0_14 = arith.constant 0 : index
    %c0_15 = arith.constant 0 : index
    %22 = vector.load %arg6[%c0_14, %c0_15] : memref<1x256xf32, #tpu.memory_space<vmem>>, vector<1x256xf32>
    %23 = vector.broadcast %22 : vector<1x256xf32> to vector<2x256xf32>
    %24 = arith.mulf %21, %23 : vector<2x256xf32>
    %cst_16 = arith.constant dense<0.000000e+00> : vector<2xf32>
    %25 = vector.multi_reduction <add>, %24, %cst_16 [1] : vector<2x256xf32> to vector<2xf32>
    %26 = vector.shape_cast %25 : vector<2xf32> to vector<2x1xf32>
    %c0_17 = arith.constant 0 : index
    %c0_18 = arith.constant 0 : index
    %27 = vector.load %arg7[%c0_17, %c0_18] : memref<1x1xf32, #tpu.memory_space<vmem>>, vector<1x1xf32>
    %28 = vector.broadcast %27 : vector<1x1xf32> to vector<2x1xf32>
    %29 = arith.addf %26, %28 : vector<2x1xf32>
    %c0_19 = arith.constant 0 : index
    %c0_20 = arith.constant 0 : index
    %30 = vector.load %arg8[%c0_19, %c0_20] : memref<2x1xf32, #tpu.memory_space<vmem>>, vector<2x1xf32>
    tpu.vector_store %arg8[%c0_19, %c0_20], %29 {strides = array<i32>} : memref<2x1xf32, #tpu.memory_space<vmem>>, vector<2x1xf32>,
    return
  }
  func.func @transform_0(%arg0: i32) -> (i32, i32) {
    %c0_i32 = arith.constant 0 : i32
    %c0_i32_0 = arith.constant 0 : i32
    return %arg0, %c0_i32 : i32, i32
  }
  func.func @transform_1(%arg0: i32) -> (i32, i32) {
    %c0_i32 = arith.constant 0 : i32
    %c0_i32_0 = arith.constant 0 : i32
    %c0_i32_1 = arith.constant 0 : i32
    return %c0_i32, %c0_i32_0 : i32, i32
  }
  func.func @transform_2(%arg0: i32) -> (i32, i32) {
    %c0_i32 = arith.constant 0 : i32
    %c0_i32_0 = arith.constant 0 : i32
    %c0_i32_1 = arith.constant 0 : i32
    return %c0_i32, %c0_i32_0 : i32, i32
  }
  func.func @transform_3(%arg0: i32) -> (i32, i32) {
    %c0_i32 = arith.constant 0 : i32
    %c0_i32_0 = arith.constant 0 : i32
    %c0_i32_1 = arith.constant 0 : i32
    return %c0_i32, %c0_i32_0 : i32, i32
  }
  func.func @transform_4(%arg0: i32) -> (i32, i32) {
    %c0_i32 = arith.constant 0 : i32
    %c0_i32_0 = arith.constant 0 : i32
    %c0_i32_1 = arith.constant 0 : i32
    return %c0_i32, %c0_i32_0 : i32, i32
  }
  func.func @transform_5(%arg0: i32) -> (i32, i32) {
    %c0_i32 = arith.constant 0 : i32
    %c0_i32_0 = arith.constant 0 : i32
    %c0_i32_1 = arith.constant 0 : i32
    return %c0_i32, %c0_i32_0 : i32, i32
  }
  func.func @transform_6(%arg0: i32) -> (i32, i32) {
    %c0_i32 = arith.constant 0 : i32
    %c0_i32_0 = arith.constant 0 : i32
    %c0_i32_1 = arith.constant 0 : i32
    return %c0_i32, %c0_i32_0 : i32, i32
  }
  func.func @transform_7(%arg0: i32) -> (i32, i32) {
    %c0_i32 = arith.constant 0 : i32
    %c0_i32_0 = arith.constant 0 : i32
    return %arg0, %c0_i32 : i32, i32
  }
}

</mosaic_0001>

<bundles_post_ra>
// kernel: tpu_custom_call.1
= control target key start
LH: loop header
LB: loop body
LE: loop exit
PB: predicated region body
PF: predicated region fallthrough
CT: control target
= control target key end

     0   :  { %s763_s0 = inlined_call_operand.vmem [shape: bf16[2,128], index: 0, kind: input, shape index: {}]   ;;  %s764_s1 = inlined_call_operand.hbm [shape: bf16[128,256], index: 1, kind: input, shape index: {}]   ;;  %s765_s2 = inlined_call_operand.vmem [shape: f32[1,256], index: 2, kind: input, shape index: {}]   ;;  %s766_s3 = inlined_call_operand.hbm [shape: bf16[256,256], index: 3, kind: input, shape index: {}]   ;;  %s767_s4 = inlined_call_operand.vmem [shape: f32[1,256], index: 4, kind: input, shape index: {}]   ;;  %s768_s5 = inlined_call_operand.vmem [shape: f32[1,256], index: 5, kind: input, shape index: {}]   ;;  %s769_s6 = inlined_call_operand.<no memory space> [shape: f32[1,1], index: 6, kind: input, shape index: {}]   ;;  %s770_s7 = inlined_call_operand.vmem [shape: f32[2,1], index: 7, kind: output, shape index: {}]  }
   0x1   :  { %v12_v0 = vstv %s769_s6 }
   0x2   :  { %13 = vst [vmem:[#allocation2] sm:$0x1] %v12_v0 }
   0x3   :  { %14 = vsyncpa [#allocation4], 0 }
   0x4   :  { %15 = vsyncpa [#allocation6], 0  ;;  %s676_s26 = smov [#allocation3]   ;;  %s628_s30 = scalar_lea.hbm %s764_s1, 2048 }
   0x5   :  { %s23_s27 = sshll.u32 %s676_s26, 4  ;;  %p629_p0 = scmp.ne.s32.totalorder %s764_s1, %s628_s30  ;;  %s24_s27 = int_to_ptr.vmem [resolvable:$true] %s23_s27 }
   0x6   :  { %p632_p1 = scmp.lt.u32.totalorder %s628_s30, %s764_s1 }
   0x8   :  { %p634_p2 = pnand %p632_p1, %p629_p0 }
   0xa   :  { %637 = shalt.err (!%p634_p2)
}
   0xb   :  { %s638_s6 = scalar_lea.vmem %s24_s27, 2048  ;;  %p643_p4 = scmp.lt.s32.totalorder %s24_s27, %s24_s27 }
   0xc   :  { %p639_p3 = scmp.ne.s32.totalorder %s24_s27, %s638_s6  ;;  %p644_p5 = scmp.lt.s32.totalorder %s638_s6, %s638_s6 }
   0xe   :  { %p645_p6 = por %p644_p5, %p643_p4 }
  0x10   :  { %p646_p7 = pnand %p645_p6, %p639_p3 }
  0x12   :  { %649 = shalt.err (!%p646_p7)
}
  0x13   :  { %s677_s12 = smov 128   ;;  %s678_s13 = smov 8  }
  0x14   :  { %29 = dma.hbm_to_vmem [thread:$0]  %s764_s1, 2048, %s24_s27, [#allocation4], %s677_s12, %s677_s12, %s678_s13  }
  0x15   :  { %s679_s16 = smov [#allocation5]   ;;  %s650_s20 = scalar_lea.hbm %s766_s3, 4096 }
  0x16   :  { %s37_s17 = sshll.u32 %s679_s16, 4  ;;  %p651_p8 = scmp.ne.s32.totalorder %s766_s3, %s650_s20  ;;  %s38_s17 = int_to_ptr.vmem [resolvable:$true] %s37_s17 }
  0x17   :  { %p654_p9 = scmp.lt.u32.totalorder %s650_s20, %s766_s3 }
  0x19   :  { %p656_p10 = pnand %p654_p9, %p651_p8 }
  0x1b   :  { %659 = shalt.err (!%p656_p10)
}
  0x1c   :  { %s660_s25 = scalar_lea.vmem %s38_s17, 4096  ;;  %p665_p12 = scmp.lt.s32.totalorder %s38_s17, %s38_s17 }
  0x1d   :  { %p661_p11 = scmp.ne.s32.totalorder %s38_s17, %s660_s25  ;;  %p666_p13 = scmp.lt.s32.totalorder %s660_s25, %s660_s25 }
  0x1f   :  { %p667_p0 = por %p666_p13, %p665_p12 }
  0x21   :  { %p668_p1 = pnand %p667_p0, %p661_p11 }
  0x23   :  { %671 = shalt.err (!%p668_p1)
}
  0x24   :  { %43 = dma.hbm_to_vmem [thread:$0]  %s766_s3, 4096, %s38_s17, [#allocation6], %s677_s12, %s677_s12, %s678_s13  }
  0x25   :  { %672 = dma.done.wait [#allocation4], 2048  }
  0x26   :  { %673 = vsyncadd [#allocation4], 4294965248 }
  0x27   :  { %674 = dma.done.wait [#allocation6], 4096  }
  0x28   :  { %675 = vsyncadd [#allocation6], 4294963200  ;;  %v680_v1 = vmov 0   ;;  %v556_v2 = vld [vmem:[#allocation3 + $0x4] ss:$8 sps:$4 sm:$0xff]   ;;  %v76_v51 = vlaneseq  ;;  %vm480_vm4 = vcmask 1041408  }
  0x29   :  { %198 = vmatprep.mubr.bf16.mxu0 %v680_v1  ;;  %v558_v3 = vld [vmem:[#allocation3] ss:$8 sps:$4 sm:$0xff]   ;;  %166 = vmatprep.subr.bf16.mxu0 %v556_v2  ;;  %v559_v4 = vld [vmem:[#allocation3 + $0x14] ss:$8 sps:$4 sm:$0xff]   ;;  %v561_v5 = vld [vmem:[#allocation3 + $0x10] ss:$8 sps:$4 sm:$0xff]  }
  0x2a   :  { %167 = vmatpush1.bf16.msra.mxu0 %v558_v3  ;;  %v562_v6 = vld [vmem:[#allocation3 + $0x24] ss:$8 sps:$4 sm:$0xff]   ;;  %v564_v7 = vld [vmem:[#allocation3 + $0x20] ss:$8 sps:$4 sm:$0xff]   ;;  %v565_v8 = vld [vmem:[#allocation3 + $0x34] ss:$8 sps:$4 sm:$0xff]  }
  0x2b   :  { %168 = vmatprep.subr.bf16.mxu0 %v559_v4  ;;  %v567_v9 = vld [vmem:[#allocation3 + $0x30] ss:$8 sps:$4 sm:$0xff]   ;;  %v568_v10 = vld [vmem:[#allocation3 + $0x44] ss:$8 sps:$4 sm:$0xff]   ;;  %v582_v12 = vld [vmem:[#allocation5] ss:$8 sps:$4 sm:$0xff]  }
  0x2c   :  { %v580_v11 = vld [vmem:[#allocation5 + $0x4] ss:$8 sps:$4 sm:$0xff]   ;;  %v583_v13 = vld [vmem:[#allocation5 + $0x14] ss:$8 sps:$4 sm:$0xff]   ;;  %v570_v14 = vld [vmem:[#allocation3 + $0x40] ss:$8 sps:$4 sm:$0xff]  }
  0x2d   :  { %419 = vmatprep.subr.bf16.mxu1 %v580_v11  ;;  %v585_v15 = vld [vmem:[#allocation5 + $0x10] ss:$8 sps:$4 sm:$0xff]   ;;  %v586_v16 = vld [vmem:[#allocation5 + $0x24] ss:$8 sps:$4 sm:$0xff]   ;;  %v571_v17 = vld [vmem:[#allocation3 + $0x54] ss:$8 sps:$4 sm:$0xff]  }
  0x2e   :  { %169 = vmatpush1.bf16.msra.mxu0 %v561_v5  ;;  %420 = vmatpush1.bf16.msra.mxu1 %v582_v12  ;;  %v573_v18 = vld [vmem:[#allocation3 + $0x50] ss:$8 sps:$4 sm:$0xff]   ;;  %v588_v19 = vld [vmem:[#allocation5 + $0x20] ss:$8 sps:$4 sm:$0xff]   ;;  %v589_v20 = vld [vmem:[#allocation5 + $0x34] ss:$8 sps:$4 sm:$0xff]  }
  0x2f   :  { %170 = vmatprep.subr.bf16.mxu0 %v562_v6  ;;  %421 = vmatprep.subr.bf16.mxu1 %v583_v13  ;;  %v574_v21 = vld [vmem:[#allocation3 + $0x64] ss:$8 sps:$4 sm:$0xff]   ;;  %v576_v22 = vld [vmem:[#allocation3 + $0x60] ss:$8 sps:$4 sm:$0xff]   ;;  %v591_v23 = vld [vmem:[#allocation5 + $0x30] ss:$8 sps:$4 sm:$0xff]  }
  0x30   :  { %v592_v24 = vld [vmem:[#allocation5 + $0x44] ss:$8 sps:$4 sm:$0xff]   ;;  %v577_v25 = vld [vmem:[#allocation3 + $0x74] ss:$8 sps:$4 sm:$0xff]   ;;  %v579_v26 = vld [vmem:[#allocation3 + $0x70] ss:$8 sps:$4 sm:$0xff]  }
  0x31   :  { %v594_v27 = vld [vmem:[#allocation5 + $0x40] ss:$8 sps:$4 sm:$0xff]   ;;  %v595_v28 = vld [vmem:[#allocation5 + $0x54] ss:$8 sps:$4 sm:$0xff]   ;;  %v597_v29 = vld [vmem:[#allocation5 + $0x50] ss:$8 sps:$4 sm:$0xff]  }
  0x32   :  { %171 = vmatpush1.bf16.msra.mxu0 %v564_v7  ;;  %422 = vmatpush1.bf16.msra.mxu1 %v585_v15  ;;  %v57_v30 = vld [vmem:[%s763_s0] sm:$0x1]  ;;  %v598_v31 = vld [vmem:[#allocation5 + $0x64] ss:$8 sps:$4 sm:$0xff]   ;;  %v600_v32 = vld [vmem:[#allocation5 + $0x60] ss:$8 sps:$4 sm:$0xff]  }
  0x33   :  { %172 = vmatprep.subr.bf16.mxu0 %v565_v8  ;;  %423 = vmatprep.subr.bf16.mxu1 %v586_v16  ;;  %v601_v33 = vld [vmem:[#allocation5 + $0x74] ss:$8 sps:$4 sm:$0xff]   ;;  %v603_v34 = vld [vmem:[#allocation5 + $0x70] ss:$8 sps:$4 sm:$0xff]   ;;  %v604_v35 = vld [vmem:[#allocation5 + $0x84] ss:$8 sps:$4 sm:$0xff]  }
  0x34   :  { %v606_v36 = vld [vmem:[#allocation5 + $0x80] ss:$8 sps:$4 sm:$0xff]   ;;  %v607_v37 = vld [vmem:[#allocation5 + $0x94] ss:$8 sps:$4 sm:$0xff]   ;;  %v609_v38 = vld [vmem:[#allocation5 + $0x90] ss:$8 sps:$4 sm:$0xff]  }
  0x35   :  { %v610_v39 = vld [vmem:[#allocation5 + $0xa4] ss:$8 sps:$4 sm:$0xff]   ;;  %v612_v40 = vld [vmem:[#allocation5 + $0xa0] ss:$8 sps:$4 sm:$0xff]   ;;  %v613_v41 = vld [vmem:[#allocation5 + $0xb4] ss:$8 sps:$4 sm:$0xff]  }
  0x36   :  { %173 = vmatpush1.bf16.msra.mxu0 %v567_v9  ;;  %424 = vmatpush1.bf16.msra.mxu1 %v588_v19  ;;  %v615_v42 = vld [vmem:[#allocation5 + $0xb0] ss:$8 sps:$4 sm:$0xff]   ;;  %v616_v43 = vld [vmem:[#allocation5 + $0xc4] ss:$8 sps:$4 sm:$0xff]   ;;  %v618_v44 = vld [vmem:[#allocation5 + $0xc0] ss:$8 sps:$4 sm:$0xff]  }
  0x37   :  { %174 = vmatprep.subr.bf16.mxu0 %v568_v10  ;;  %425 = vmatprep.subr.bf16.mxu1 %v589_v20  ;;  %v619_v45 = vld [vmem:[#allocation5 + $0xd4] ss:$8 sps:$4 sm:$0xff]   ;;  %v621_v46 = vld [vmem:[#allocation5 + $0xd0] ss:$8 sps:$4 sm:$0xff]   ;;  %v622_v47 = vld [vmem:[#allocation5 + $0xe4] ss:$8 sps:$4 sm:$0xff]  }
  0x38   :  { %v624_v48 = vld [vmem:[#allocation5 + $0xe0] ss:$8 sps:$4 sm:$0xff]   ;;  %v625_v49 = vld [vmem:[#allocation5 + $0xf4] ss:$8 sps:$4 sm:$0xff]   ;;  %v627_v50 = vld [vmem:[#allocation5 + $0xf0] ss:$8 sps:$4 sm:$0xff]  }
  0x39   :  { %v77_v52 = vshrl.u32 %v76_v51, 7  ;;  %v74_v54 = vld [vmem:[%s765_s2] sm:$0x3]  ;;  %vm494_vm5 = vcmask 1024  }
  0x3a   :  { %175 = vmatpush1.bf16.msra.mxu0 %v570_v14  ;;  %426 = vmatpush1.bf16.msra.mxu1 %v591_v23  ;;  %v247_v6 = vld [vmem:[%s767_s4] sm:$0x3] }
  0x3b   :  { %176 = vmatprep.subr.bf16.mxu0 %v571_v17  ;;  %427 = vmatprep.subr.bf16.mxu1 %v592_v24  ;;  %v78_v53 = vsub.s32 0, %v77_v52  ;;  %v82_v55 = vsub.s32 1, %v77_v52  ;;  %v466_v9 = vld [vmem:[%s768_s5] sm:$0x3] }
  0x3d   :  { %v79_v56 = vrot.slane %v74_v54, %v78_v53  ;;  %v83_v57 = vrot.slane %v74_v54, %v82_v55  ;;  %v252_v7 = vrot.slane %v247_v6, %v78_v53  ;;  %v256_v8 = vrot.slane %v247_v6, %v82_v55 }
  0x3e   :  { %177 = vmatpush1.bf16.msra.mxu0 %v573_v18  ;;  %428 = vmatpush1.bf16.msra.mxu1 %v594_v27  ;;  %v471_v15 = vrot.slane %v466_v9, %v78_v53  ;;  %v475_v18 = vrot.slane %v466_v9, %v82_v55  ;;  %v550_v27 = vld [vmem:[#allocation2] ss:$0 sm:$0xff] }
  0x3f   :  { %178 = vmatprep.subr.bf16.mxu0 %v574_v21  ;;  %429 = vmatprep.subr.bf16.mxu1 %v595_v28 }
  0x42   :  { %179 = vmatpush1.bf16.msra.mxu0 %v576_v22  ;;  %430 = vmatpush1.bf16.msra.mxu1 %v597_v29 }
  0x43   :  { %180 = vmatprep.subr.bf16.mxu0 %v577_v25  ;;  %431 = vmatprep.subr.bf16.mxu1 %v598_v31 }
  0x46   :  { %181 = vmatpush1.bf16.msra.mxu0 %v579_v26  ;;  %432 = vmatpush1.bf16.msra.mxu1 %v600_v32 }
  0x47   :  { %433 = vmatprep.subr.bf16.mxu1 %v601_v33 }
  0x49   :  { %199 = vmatmul.mubr.bf16.vlgmr.msra.gmra.mrb[0].mxu0 %v57_v30 }
  0x4a   :  { %434 = vmatpush1.bf16.msra.mxu1 %v603_v34 }
  0x4b   :  { %435 = vmatprep.subr.bf16.mxu1 %v604_v35 }
  0x4e   :  { %436 = vmatpush1.bf16.msra.mxu1 %v606_v36 }
  0x4f   :  { %437 = vmatprep.subr.bf16.mxu1 %v607_v37 }
  0x52   :  { %438 = vmatpush1.bf16.msra.mxu1 %v609_v38 }
  0x53   :  { %439 = vmatprep.subr.bf16.mxu1 %v610_v39 }
  0x56   :  { %440 = vmatpush1.bf16.msra.mxu1 %v612_v40 }
  0x57   :  { %441 = vmatprep.subr.bf16.mxu1 %v613_v41 }
  0x5a   :  { %442 = vmatpush1.bf16.msra.mxu1 %v615_v42 }
  0x5b   :  { %443 = vmatprep.subr.bf16.mxu1 %v616_v43 }
  0x5e   :  { %444 = vmatpush1.bf16.msra.mxu1 %v618_v44 }
  0x5f   :  { %445 = vmatprep.subr.bf16.mxu1 %v619_v45 }
  0x62   :  { %446 = vmatpush1.bf16.msra.mxu1 %v621_v46 }
  0x63   :  { %447 = vmatprep.subr.bf16.mxu1 %v622_v47 }
  0x66   :  { %448 = vmatpush1.bf16.msra.mxu1 %v624_v48 }
  0x67   :  { %449 = vmatprep.subr.bf16.mxu1 %v625_v49 }
  0x6a   :  { %450 = vmatpush1.bf16.msra.mxu1 %v627_v50 }
 0x11c   :  { %v200_v58 = vpop.f32.mrb[0].mxu0 }
 0x11d   :  { %v201_v59 = vadd.f32 %v200_v58, %v79_v56  ;;  %v202_v60 = vpop.f32.mrb[1].mxu0 }
 0x11e   :  { %v203_v61 = vadd.f32 %v202_v60, %v83_v57  ;;  %v204_v62 = vpop.f32.mrb[2].mxu0 }
 0x11f   :  { %vm207_vm0 = vcmp.ge.f32.partialorder %v201_v59, 0.0  ;;  %v209_v63 = vmul.f32 0.2, %v201_v59  ;;  %v205_v0 = vpop.f32.mrb[3].mxu0 }
 0x120   :  { %vm208_vm1 = vcmp.ge.f32.partialorder %v203_v61, 0.0  ;;  %v210_v1 = vmul.f32 0.2, %v203_v61 }
 0x121   :  { %v211_v2 = vsel %vm207_vm0, %v201_v59, %v209_v63 }
 0x122   :  { %v212_v3 = vsel %vm208_vm1, %v203_v61, %v210_v1  ;;  %v213_v5 = vpack.c.bf16 %v211_v2, %v211_v2 }
 0x123   :  { %v214_v4 = vpack.c.bf16 %v212_v3, %v212_v3 }
 0x125   :  { %451 = vmatprep.mubr.bf16.mxu1 %v214_v4 }
 0x126   :  { %452 = vmatmul.mubr.bf16.vlgmr.msra.gmra.mrb[0].mxu1 %v213_v5 }
 0x1f9   :  { %v453_v10 = vpop.f32.mrb[0].mxu1 }
 0x1fa   :  { %v454_v11 = vadd.f32 %v453_v10, %v252_v7  ;;  %v455_v12 = vpop.f32.mrb[1].mxu1 }
 0x1fb   :  { %v456_v13 = vadd.f32 %v455_v12, %v256_v8  ;;  %v457_v14 = vpop.f32.mrb[2].mxu1 }
 0x1fc   :  { %vm460_vm2 = vcmp.ge.f32.partialorder %v454_v11, 0.0  ;;  %v462_v16 = vmul.f32 0.2, %v454_v11  ;;  %v458_v17 = vpop.f32.mrb[3].mxu1 }
 0x1fd   :  { %vm461_vm3 = vcmp.ge.f32.partialorder %v456_v13, 0.0  ;;  %v463_v19 = vmul.f32 0.2, %v456_v13 }
 0x1fe   :  { %v464_v20 = vsel %vm460_vm2, %v454_v11, %v462_v16 }
 0x1ff   :  { %v465_v21 = vsel %vm461_vm3, %v456_v13, %v463_v19  ;;  %v478_v22 = vmul.f32 %v471_v15, %v464_v20 }
 0x200   :  { %v479_v23 = vmul.f32 %v475_v18, %v465_v21 }
 0x201   :  { %v481_v24 = vsel %vm480_vm4, %v478_v22, 0.0 }
 0x202   :  { %v482_v25 = vsel %vm480_vm4, %v479_v23, 0.0 }
 0x203   :  { %v483_v26 = vadd.f32 %v482_v25, %v481_v24 }
 0x205   :  { %484 = vadd.xlane.f32.xlu0 %v483_v26 }
 0x292   :  { %v485_v28 = vpop.xlane.xlu0 %484 }
 0x293   :  { %v493_v29 = vadd.f32 %v550_v27, %v485_v28 }
 0x295   :  { %495 = vst.msk [vmem:[%s770_s7] sm:$0x3] %vm494_vm5, %v493_v29 }
 0x296   :  { %500 = vsyncpa [#allocation4], 1 }
 0x297   :  { %501 = vsyncpa [#allocation6], 1 }

</bundles_post_ra>
